<compile_context>
chip_gen: v7x
topology: tpu7x:2x2x1
jax: 0.10.0
libtpu: 0.0.40
codegen_flags: <defaults>
</compile_context>

<pallas_src>
import functools

import jax
import jax.numpy as jnp
from jax import lax
from jax.experimental import pallas as pl
from jax.experimental.pallas import tpu as pltpu


def _round_up(x: int, m: int) -> int:
    return ((x + m - 1) // m) * m


def _minpool_kernel(x_ref, o_ref, acc_ref, *, hw, ts, mask_tail):
    # x_ref: (TR, TS) input tile, o_ref: (TR, 1) output (resident across the
    # spatial axis), acc_ref: (TR, 128) f32 per-lane min accumulator scratch.
    k = pl.program_id(1)

    @pl.when(k == 0)
    def _init():
        acc_ref[...] = jnp.full(acc_ref.shape, jnp.inf, dtype=acc_ref.dtype)

    tr = x_ref.shape[0]
    m = acc_ref[...]
    if mask_tail:
        # Global column index of each lane in this tile; computed once and
        # offset per 128-lane slice (pure VPU work, free under the DMA).
        lane = lax.broadcasted_iota(jnp.int32, (tr, 128), 1)
        base = k * ts

    # Elementwise (VPU) min over aligned 128-lane slices -> (TR, 128); no
    # per-step cross-lane (XLU) reduction.
    for j in range(ts // 128):
        sl = x_ref[:, j * 128:(j + 1) * 128].astype(jnp.float32)
        if mask_tail:
            col = base + (j * 128) + lane
            sl = jnp.where(col < hw, sl, jnp.inf)
        m = jnp.minimum(m, sl)
    acc_ref[...] = m

    @pl.when(k == pl.num_programs(1) - 1)
    def _finalize():
        # Single XLU lane reduction per row block, then negate only the
        # per-row result.
        row_min = jnp.min(acc_ref[...], axis=-1, keepdims=True)
        o_ref[...] = (-row_min).astype(o_ref.dtype)


def min_pool(x: jax.Array) -> jax.Array:
    """AdaptiveMaxPool2d((1,1)) applied to -x, for NCHW input."""
    n, c, h, w = x.shape
    nc, hw = n * c, h * w
    x2d = x.reshape(nc, hw)

    itemsize = jnp.dtype(x.dtype).itemsize

    # Row tile: multiple of 8 sublanes, capped at 512.
    tr = min(512, _round_up(nc, 8))
    # Spatial tile: multiple of 128 lanes; keep the tile near 4 MiB and the
    # in-kernel unroll at <= 16 slices.
    TS_MAX = 2048
    ts_cap = min(TS_MAX, max(128, ((4 << 20) // (tr * itemsize)) // 128 * 128))
    ts = min(ts_cap, _round_up(hw, 128))

    rows = pl.cdiv(nc, tr)
    cols = pl.cdiv(hw, ts)
    out_rows = rows * tr            # output padded to a TR multiple (cheap)
    mask_tail = (hw % ts) != 0      # static: last spatial tile has garbage

    kernel = functools.partial(_minpool_kernel, hw=hw, ts=ts, mask_tail=mask_tail)

    out2d = pl.pallas_call(
        kernel,
        out_shape=jax.ShapeDtypeStruct((out_rows, 1), x.dtype),
        grid=(rows, cols),
        in_specs=[pl.BlockSpec((tr, ts), lambda i, k: (i, k))],
        out_specs=pl.BlockSpec((tr, 1), lambda i, k: (i, 0)),
        scratch_shapes=[pltpu.VMEM((tr, 128), jnp.float32)],
        compiler_params=pltpu.CompilerParams(
            dimension_semantics=("parallel", "arbitrary"),
        ),
        cost_estimate=pl.CostEstimate(
            flops=nc * hw,
            transcendentals=0,
            bytes_accessed=nc * hw * itemsize + nc * itemsize,
        ),
    )(x2d)

    return out2d[:nc].reshape(n, c, 1, 1)


def min_pool_ref(x: jax.Array) -> jax.Array:
    # Pure-JAX reference for verification.
    return jnp.max(-x, axis=(2, 3), keepdims=True)


if __name__ == "__main__":
    key = jax.random.PRNGKey(0)

    # Aligned small case (matches module usage; NCHW).
    x = jax.random.normal(key, (2, 4, 16, 16), dtype=jnp.float32)
    out = min_pool(x)
    jax.block_until_ready(out)
    ref = min_pool_ref(x)
    assert out.shape == (2, 4, 1, 1), out.shape
    assert jnp.allclose(out, ref), "mismatch vs reference (aligned case)"

    # Unaligned case to exercise the in-kernel +inf tail-masking path.
    k2 = jax.random.PRNGKey(1)
    x2 = jax.random.normal(k2, (2, 3, 7, 9), dtype=jnp.float32)
    out2 = min_pool(x2)
    jax.block_until_ready(out2)
    assert out2.shape == (2, 3, 1, 1), out2.shape
    assert jnp.allclose(out2, min_pool_ref(x2)), "mismatch vs reference (tail case)"

    print("KERNEL_OK")
</pallas_src>

<mosaic_0001>
module attributes {stable_mosaic.version = 11 : i64} {
  func.func @_minpool_kernel(%arg0: i32, %arg1: i32, %arg2: memref<8x256xf32, #tpu.memory_space<vmem>>, %arg3: memref<8x1xf32, #tpu.memory_space<vmem>>, %arg4: memref<8x128xf32, #tpu.memory_space<vmem>>) attributes {dimension_semantics = [#tpu.dimension_semantics<parallel>, #tpu.dimension_semantics<arbitrary>], iteration_bounds = array<i64: 1, 1>, scalar_prefetch = 0 : i64, scratch_operands = 1 : i64, tpu.core_type = #tpu.core_type<tc>, window_params = [{transform_indices = @transform_0, window_bounds = array<i64: 8, 256>}, {transform_indices = @transform_1, window_bounds = array<i64: 8, 1>}]} {
    %c0_i32 = arith.constant 0 : i32
    %0 = arith.cmpi eq, %arg1, %c0_i32 : i32
    %1 = arith.extui %0 : i1 to i32
    %c0_i32_0 = arith.constant 0 : i32
    %2 = arith.cmpi ne, %1, %c0_i32_0 : i32
    scf.if %2 {
      %cst = arith.constant 0x7F800000 : f32
      %12 = vector.broadcast %cst : f32 to vector<8x128xf32>
      %c0_9 = arith.constant 0 : index
      %c0_10 = arith.constant 0 : index
      %13 = vector.load %arg4[%c0_9, %c0_10] : memref<8x128xf32, #tpu.memory_space<vmem>>, vector<8x128xf32>
      tpu.vector_store %arg4[%c0_9, %c0_10], %12 {strides = array<i32>} : memref<8x128xf32, #tpu.memory_space<vmem>>, vector<8x128xf32>,
    } else {
    }
    %c0 = arith.constant 0 : index
    %c0_1 = arith.constant 0 : index
    %3 = vector.load %arg4[%c0, %c0_1] : memref<8x128xf32, #tpu.memory_space<vmem>>, vector<8x128xf32>
    %c0_2 = arith.constant 0 : index
    %c0_3 = arith.constant 0 : index
    %4 = vector.load %arg2[%c0_2, %c0_3] : memref<8x256xf32, #tpu.memory_space<vmem>>, vector<8x128xf32>
    %5 = arith.minimumf %3, %4 : vector<8x128xf32>
    %c0_4 = arith.constant 0 : index
    %c128 = arith.constant 128 : index
    %6 = vector.load %arg2[%c0_4, %c128] : memref<8x256xf32, #tpu.memory_space<vmem>>, vector<8x128xf32>
    %7 = arith.minimumf %5, %6 : vector<8x128xf32>
    %c0_5 = arith.constant 0 : index
    %c0_6 = arith.constant 0 : index
    %8 = vector.load %arg4[%c0_5, %c0_6] : memref<8x128xf32, #tpu.memory_space<vmem>>, vector<8x128xf32>
    tpu.vector_store %arg4[%c0_5, %c0_6], %7 {strides = array<i32>} : memref<8x128xf32, #tpu.memory_space<vmem>>, vector<8x128xf32>,
    %c0_i32_7 = arith.constant 0 : i32
    %9 = arith.cmpi eq, %arg1, %c0_i32_7 : i32
    %10 = arith.extui %9 : i1 to i32
    %c0_i32_8 = arith.constant 0 : i32
    %11 = arith.cmpi ne, %10, %c0_i32_8 : i32
    scf.if %11 {
      %c0_9 = arith.constant 0 : index
      %c0_10 = arith.constant 0 : index
      %12 = vector.load %arg4[%c0_9, %c0_10] : memref<8x128xf32, #tpu.memory_space<vmem>>, vector<8x128xf32>
      %cst = arith.constant dense<0x7F800000> : vector<8xf32>
      %13 = vector.multi_reduction <minimumf>, %12, %cst [1] : vector<8x128xf32> to vector<8xf32>
      %14 = vector.shape_cast %13 : vector<8xf32> to vector<8x1xf32>
      %cst_11 = arith.constant 0.000000e+00 : f32
      %15 = vector.broadcast %cst_11 : f32 to vector<8x1xf32>
      %16 = arith.subf %15, %14 : vector<8x1xf32>
      %c0_12 = arith.constant 0 : index
      %c0_13 = arith.constant 0 : index
      %17 = vector.load %arg3[%c0_12, %c0_13] : memref<8x1xf32, #tpu.memory_space<vmem>>, vector<8x1xf32>
      tpu.vector_store %arg3[%c0_12, %c0_13], %16 {strides = array<i32>} : memref<8x1xf32, #tpu.memory_space<vmem>>, vector<8x1xf32>,
    } else {
    }
    return
  }
  func.func @transform_0(%arg0: i32, %arg1: i32) -> (i32, i32) {
    %c0_i32 = arith.constant 0 : i32
    return %arg0, %arg1 : i32, i32
  }
  func.func @transform_1(%arg0: i32, %arg1: i32) -> (i32, i32) {
    %c0_i32 = arith.constant 0 : i32
    %c0_i32_0 = arith.constant 0 : i32
    return %arg0, %c0_i32 : i32, i32
  }
}

</mosaic_0001>

<bundles_post_ra>
// kernel: tpu_custom_call.1
= control target key start
LH: loop header
LB: loop body
LE: loop exit
PB: predicated region body
PF: predicated region fallthrough
CT: control target
= control target key end

     0   :  { %6 = vsyncpa [#allocation4], 0  ;;  %s70_s6 = smov [#allocation3]   ;;  %s96_s0 = inlined_call_operand.hbm [shape: f32[8,256], index: 0, kind: input, shape index: {}]   ;;  %s97_s1 = inlined_call_operand.vmem [shape: f32[8,1], index: 1, kind: output, shape index: {}]  }
   0x1   :  { %s13_s7 = sshll.u32 %s70_s6, 4  ;;  %s46_s10 = scalar_lea.hbm %s96_s0, 256  ;;  %s14_s7 = int_to_ptr.vmem [resolvable:$true] %s13_s7 }
   0x2   :  { %p47_p0 = scmp.ne.s32.totalorder %s96_s0, %s46_s10  ;;  %p50_p1 = scmp.lt.u32.totalorder %s46_s10, %s96_s0 }
   0x4   :  { %p52_p2 = pnand %p50_p1, %p47_p0 }
   0x6   :  { %55 = shalt.err (!%p52_p2)
}
   0x7   :  { %s56_s15 = scalar_lea.vmem %s14_s7, 256  ;;  %p61_p4 = scmp.lt.s32.totalorder %s14_s7, %s14_s7 }
   0x8   :  { %p57_p3 = scmp.ne.s32.totalorder %s14_s7, %s56_s15  ;;  %p62_p5 = scmp.lt.s32.totalorder %s56_s15, %s56_s15 }
   0xa   :  { %p63_p6 = por %p62_p5, %p61_p4 }
   0xc   :  { %p64_p7 = pnand %p63_p6, %p57_p3 }
   0xe   :  { %67 = shalt.err (!%p64_p7)
}
   0xf   :  { %16 = dma.hbm_to_vmem [thread:$0]  %s96_s0, 256, %s14_s7, [#allocation4]  }
  0x10   :  { %68 = dma.done.wait [#allocation4], 256  }
  0x11   :  { %69 = vsyncadd [#allocation4], 4294967040  ;;  %v26_v0 = vld [vmem:[#allocation3] sm:$0xff]  ;;  %v28_v1 = vld [vmem:[#allocation3 + $0x8] sm:$0xff]  ;;  %vm38_vm0 = vcmask 7168  }
  0x12   :  { %v29_v2 = vmin.f32 %v26_v0, %v28_v1 }
  0x14   :  { %35 = vmin.xlane.f32.xlu0 %v29_v2 }
  0xa1   :  { %v36_v3 = vpop.xlane.xlu0 %35 }
  0xa2   :  { %v37_v4 = vsub.f32 0.0, %v36_v3 }
  0xa4   :  { %39 = vst.msk [vmem:[%s97_s1] sm:$0xff] %vm38_vm0, %v37_v4 }
  0xa5   :  { %44 = vsyncpa [#allocation4], 1 }

</bundles_post_ra>
